<compile_context>
chip_gen: v6e
topology: v6e:2x2x1
jax: 0.10.0
libtpu: 0.0.40
codegen_flags: <defaults>
</compile_context>

<pallas_src>
import functools

import jax
import jax.numpy as jnp
from jax.experimental import pallas as pl
from jax.experimental.pallas import tpu as pltpu

LANE = 128      # vreg lane width
SUBLANE = 8     # vreg sublane count


def _round_up(n, m):
    return (n + m - 1) // m * m


# --------------------------------------------------------------------------
# Kernel: the whole FuseNet forward for one batch tile.
# --------------------------------------------------------------------------
def fusenet_kernel(x_ref, w1_ref, w2_ref, w3_ref, b_ref, out_ref,
                   *, h_pad, cu_pad, r_pad):
    x = x_ref[...]

    # Packed bias slab: [b_base (h_pad) | b_common_unique (cu_pad) | b_recon (r_pad)]
    # All offsets are multiples of 128 -> lane-tile-aligned slices.
    b1 = b_ref[:, :h_pad]
    b2 = b_ref[:, h_pad:h_pad + cu_pad]
    b3 = b_ref[:, h_pad + cu_pad:]

    # base_net: Linear + ReLU
    base = jnp.maximum(
        jnp.dot(x, w1_ref[...], preferred_element_type=jnp.float32) + b1, 0.0)

    # common_net and unique_net fused into one (H, C+U) matmul + ReLU
    cu = jnp.maximum(
        jnp.dot(base, w2_ref[...], preferred_element_type=jnp.float32) + b2, 0.0)

    # reconstruct_net on concat(common, unique): single (C+U, R) matmul, no ReLU
    recon = jnp.dot(cu, w3_ref[...], preferred_element_type=jnp.float32) + b3

    # One packed, lane-dense output slab: [recon | common | unique]
    # (both stores are 128-lane aligned and 128-multiple wide -> unmasked vst).
    out_ref[:, :r_pad] = recon
    out_ref[:, r_pad:] = cu


# --------------------------------------------------------------------------
# Parameter construction (PyTorch-style layout) and packing for the kernel.
# --------------------------------------------------------------------------
def init_params(key, in_dim, hidden_dim, common_dim, unique_dim, recon_dim):
    """Weights stored (in, out) so y = x @ W + b (transpose of nn.Linear.weight)."""
    ks = jax.random.split(key, 8)
    scale = 0.1

    def lin(kw, kb, din, dout):
        w = scale * jax.random.normal(kw, (din, dout), dtype=jnp.float32)
        b = scale * jax.random.normal(kb, (1, dout), dtype=jnp.float32)
        return w, b

    wb, bb = lin(ks[0], ks[1], in_dim, hidden_dim)
    wc, bc = lin(ks[2], ks[3], hidden_dim, common_dim)
    wu, bu = lin(ks[4], ks[5], hidden_dim, unique_dim)
    wr, br = lin(ks[6], ks[7], common_dim + unique_dim, recon_dim)
    return {"wb": wb, "bb": bb, "wc": wc, "bc": bc,
            "wu": wu, "bu": bu, "wr": wr, "br": br}


def pack_params(p, in_dim, hidden_dim, common_dim, unique_dim, recon_dim):
    """Pad feature dims to 128-lane multiples and merge operands for the kernel."""
    in_pad = _round_up(in_dim, LANE)
    h_pad = _round_up(hidden_dim, LANE)
    c_pad = _round_up(common_dim, LANE)
    u_pad = _round_up(unique_dim, LANE)
    cu_pad = c_pad + u_pad
    r_pad = _round_up(recon_dim, LANE)

    # base_net weight, zero-padded (extra rows/cols contribute 0).
    w1 = jnp.zeros((in_pad, h_pad), jnp.float32).at[:in_dim, :hidden_dim].set(p["wb"])

    # common || unique weights merged column-wise (each padded to 128 lanes).
    w2 = (jnp.zeros((h_pad, cu_pad), jnp.float32)
          .at[:hidden_dim, :common_dim].set(p["wc"])
          .at[:hidden_dim, c_pad:c_pad + unique_dim].set(p["wu"]))

    # reconstruct weight: rows re-laid-out to the padded [common | unique] axis.
    w3 = (jnp.zeros((cu_pad, r_pad), jnp.float32)
          .at[:common_dim, :recon_dim].set(p["wr"][:common_dim])
          .at[c_pad:c_pad + unique_dim, :recon_dim].set(p["wr"][common_dim:]))

    # All biases packed into one lane-aligned slab (padding lanes are 0, and
    # ReLU(0) = 0, so padded hidden/common/unique lanes stay zero).
    bias = (jnp.zeros((1, h_pad + cu_pad + r_pad), jnp.float32)
            .at[:, :hidden_dim].set(p["bb"])
            .at[:, h_pad:h_pad + common_dim].set(p["bc"])
            .at[:, h_pad + c_pad:h_pad + c_pad + unique_dim].set(p["bu"])
            .at[:, h_pad + cu_pad:h_pad + cu_pad + recon_dim].set(p["br"]))

    dims = dict(in_dim=in_dim, hidden_dim=hidden_dim, common_dim=common_dim,
                unique_dim=unique_dim, recon_dim=recon_dim,
                in_pad=in_pad, h_pad=h_pad, c_pad=c_pad, u_pad=u_pad,
                cu_pad=cu_pad, r_pad=r_pad)
    return {"w1": w1, "w2": w2, "w3": w3, "b": bias, "dims": dims}


# --------------------------------------------------------------------------
# Forward wrapper: pad batch, build the grid, unpack + reshape outputs.
# --------------------------------------------------------------------------
def fusenet_forward(x, packed, window_num, feature_dim, *, batch_tile=256):
    d = packed["dims"]
    B = x.shape[0]

    # Batch padded to 8 sublanes; tile the batch axis across the grid.
    b_pad = _round_up(B, SUBLANE)
    tb = min(b_pad, _round_up(batch_tile, SUBLANE))
    b_pad = _round_up(b_pad, tb)

    x_p = jnp.zeros((b_pad, d["in_pad"]), jnp.float32).at[:B, :d["in_dim"]].set(x)

    out_pad = d["r_pad"] + d["cu_pad"]
    grid = (b_pad // tb,)

    kernel = functools.partial(fusenet_kernel, h_pad=d["h_pad"],
                               cu_pad=d["cu_pad"], r_pad=d["r_pad"])

    flops = 2 * b_pad * (d["in_pad"] * d["h_pad"]
                         + d["h_pad"] * d["cu_pad"]
                         + d["cu_pad"] * d["r_pad"])
    bytes_accessed = 4 * (b_pad * d["in_pad"]
                          + d["in_pad"] * d["h_pad"]
                          + d["h_pad"] * d["cu_pad"]
                          + d["cu_pad"] * d["r_pad"]
                          + (d["h_pad"] + d["cu_pad"] + d["r_pad"])
                          + b_pad * out_pad)

    out = pl.pallas_call(
        kernel,
        out_shape=jax.ShapeDtypeStruct((b_pad, out_pad), jnp.float32),
        grid_spec=pltpu.PrefetchScalarGridSpec(
            num_scalar_prefetch=0,
            grid=grid,
            in_specs=[
                # Only the activations are tiled over the batch grid.
                pl.BlockSpec((tb, d["in_pad"]), lambda i: (i, 0)),
                # Weights / bias: full blocks, VMEM-resident across grid steps.
                pl.BlockSpec((d["in_pad"], d["h_pad"]), lambda i: (0, 0)),
                pl.BlockSpec((d["h_pad"], d["cu_pad"]), lambda i: (0, 0)),
                pl.BlockSpec((d["cu_pad"], d["r_pad"]), lambda i: (0, 0)),
                pl.BlockSpec((1, d["h_pad"] + d["cu_pad"] + d["r_pad"]),
                             lambda i: (0, 0)),
            ],
            out_specs=pl.BlockSpec((tb, out_pad), lambda i: (i, 0)),
        ),
        compiler_params=pltpu.CompilerParams(
            dimension_semantics=("parallel",)),
        cost_estimate=pl.CostEstimate(flops=flops, transcendentals=0,
                                      bytes_accessed=bytes_accessed),
    )(x_p, packed["w1"], packed["w2"], packed["w3"], packed["b"])

    # Unpack the lane-dense slab and strip padding.
    recon = out[:B, :d["recon_dim"]]
    common = out[:B, d["r_pad"]:d["r_pad"] + d["common_dim"]]
    unique = out[:B, d["r_pad"] + d["c_pad"]:d["r_pad"] + d["c_pad"] + d["unique_dim"]]

    # torch.reshape(reconstructed, (-1, window_num, feature_dim))
    reconstructed = jnp.reshape(recon, (-1, window_num, feature_dim))
    return reconstructed, common, unique


if __name__ == "__main__":
    # Small shapes consistent with FuseNet: recon reshapes to
    # (-1, window_num, feature_dim), so in_dim = recon_dim = window_num * feature_dim.
    batch = 2
    window_num = 8
    feature_dim = 4
    in_dim = window_num * feature_dim     # 32
    hidden_dim = 32
    common_dim = 32
    unique_dim = 32
    recon_dim = window_num * feature_dim  # 32

    key = jax.random.PRNGKey(0)
    k_x, k_p = jax.random.split(key)
    x = jax.random.normal(k_x, (batch, in_dim), dtype=jnp.float32)

    params = init_params(k_p, in_dim, hidden_dim, common_dim, unique_dim, recon_dim)
    packed = pack_params(params, in_dim, hidden_dim, common_dim, unique_dim, recon_dim)

    reconstructed, common, unique = fusenet_forward(x, packed, window_num, feature_dim)
    jax.block_until_ready((reconstructed, common, unique))

    # Pure-JAX reference check (un-padded, un-fused math).
    base_r = jnp.maximum(x @ params["wb"] + params["bb"], 0.0)
    common_r = jnp.maximum(base_r @ params["wc"] + params["bc"], 0.0)
    unique_r = jnp.maximum(base_r @ params["wu"] + params["bu"], 0.0)
    concat_r = jnp.concatenate([common_r, unique_r], axis=1)
    recon_r = (concat_r @ params["wr"] + params["br"]).reshape(-1, window_num, feature_dim)

    assert reconstructed.shape == (batch, window_num, feature_dim)
    assert common.shape == (batch, common_dim)
    assert unique.shape == (batch, unique_dim)
    assert jnp.allclose(reconstructed, recon_r, atol=1e-5)
    assert jnp.allclose(common, common_r, atol=1e-5)
    assert jnp.allclose(unique, unique_r, atol=1e-5)

    print("KERNEL_OK")
</pallas_src>

<mosaic_0001>
module attributes {stable_mosaic.version = 11 : i64} {
  func.func @fusenet_kernel(%arg0: i32, %arg1: memref<8x128xf32, #tpu.memory_space<vmem>>, %arg2: memref<128x128xf32, #tpu.memory_space<vmem>>, %arg3: memref<128x256xf32, #tpu.memory_space<vmem>>, %arg4: memref<256x128xf32, #tpu.memory_space<vmem>>, %arg5: memref<1x512xf32, #tpu.memory_space<vmem>>, %arg6: memref<8x384xf32, #tpu.memory_space<vmem>>) attributes {dimension_semantics = [#tpu.dimension_semantics<parallel>], iteration_bounds = array<i64: 1>, scalar_prefetch = 0 : i64, scratch_operands = 0 : i64, tpu.core_type = #tpu.core_type<tc>, window_params = [{transform_indices = @transform_0, window_bounds = array<i64: 8, 128>}, {pipeline_mode = #tpu.pipeline_mode<synchronous>, transform_indices = @transform_1, window_bounds = array<i64: 128, 128>}, {pipeline_mode = #tpu.pipeline_mode<synchronous>, transform_indices = @transform_2, window_bounds = array<i64: 128, 256>}, {pipeline_mode = #tpu.pipeline_mode<synchronous>, transform_indices = @transform_3, window_bounds = array<i64: 256, 128>}, {pipeline_mode = #tpu.pipeline_mode<synchronous>, transform_indices = @transform_4, window_bounds = array<i64: 1, 512>}, {transform_indices = @transform_5, window_bounds = array<i64: 8, 384>}]} {
    %c0 = arith.constant 0 : index
    %c0_0 = arith.constant 0 : index
    %0 = vector.load %arg1[%c0, %c0_0] : memref<8x128xf32, #tpu.memory_space<vmem>>, vector<8x128xf32>
    %c0_1 = arith.constant 0 : index
    %c0_2 = arith.constant 0 : index
    %1 = vector.load %arg5[%c0_1, %c0_2] : memref<1x512xf32, #tpu.memory_space<vmem>>, vector<1x128xf32>
    %c0_3 = arith.constant 0 : index
    %c128 = arith.constant 128 : index
    %2 = vector.load %arg5[%c0_3, %c128] : memref<1x512xf32, #tpu.memory_space<vmem>>, vector<1x256xf32>
    %c0_4 = arith.constant 0 : index
    %c384 = arith.constant 384 : index
    %3 = vector.load %arg5[%c0_4, %c384] : memref<1x512xf32, #tpu.memory_space<vmem>>, vector<1x128xf32>
    %c0_5 = arith.constant 0 : index
    %c0_6 = arith.constant 0 : index
    %4 = vector.load %arg2[%c0_5, %c0_6] : memref<128x128xf32, #tpu.memory_space<vmem>>, vector<128x128xf32>
    %cst = arith.constant dense<0.000000e+00> : vector<8x128xf32>
    %5 = tpu.matmul %0, %4, %cst {dimension_numbers = #tpu.dot_dimension_numbers<[1], [0], [0], [1], [0, 0, 1, 1], [], []>} : vector<8x128xf32>, vector<128x128xf32>, vector<8x128xf32> -> vector<8x128xf32>
    %6 = vector.broadcast %1 : vector<1x128xf32> to vector<8x128xf32>
    %7 = arith.addf %5, %6 : vector<8x128xf32>
    %cst_7 = arith.constant 0.000000e+00 : f32
    %8 = vector.broadcast %cst_7 : f32 to vector<8x128xf32>
    %9 = arith.maximumf %7, %8 : vector<8x128xf32>
    %c0_8 = arith.constant 0 : index
    %c0_9 = arith.constant 0 : index
    %10 = vector.load %arg3[%c0_8, %c0_9] : memref<128x256xf32, #tpu.memory_space<vmem>>, vector<128x256xf32>
    %cst_10 = arith.constant dense<0.000000e+00> : vector<8x256xf32>
    %11 = tpu.matmul %9, %10, %cst_10 {dimension_numbers = #tpu.dot_dimension_numbers<[1], [0], [0], [1], [0, 0, 1, 1], [], []>} : vector<8x128xf32>, vector<128x256xf32>, vector<8x256xf32> -> vector<8x256xf32>
    %12 = vector.broadcast %2 : vector<1x256xf32> to vector<8x256xf32>
    %13 = arith.addf %11, %12 : vector<8x256xf32>
    %cst_11 = arith.constant 0.000000e+00 : f32
    %14 = vector.broadcast %cst_11 : f32 to vector<8x256xf32>
    %15 = arith.maximumf %13, %14 : vector<8x256xf32>
    %c0_12 = arith.constant 0 : index
    %c0_13 = arith.constant 0 : index
    %16 = vector.load %arg4[%c0_12, %c0_13] : memref<256x128xf32, #tpu.memory_space<vmem>>, vector<256x128xf32>
    %cst_14 = arith.constant dense<0.000000e+00> : vector<8x128xf32>
    %17 = tpu.matmul %15, %16, %cst_14 {dimension_numbers = #tpu.dot_dimension_numbers<[1], [0], [0], [1], [0, 0, 1, 1], [], []>} : vector<8x256xf32>, vector<256x128xf32>, vector<8x128xf32> -> vector<8x128xf32>
    %18 = vector.broadcast %3 : vector<1x128xf32> to vector<8x128xf32>
    %19 = arith.addf %17, %18 : vector<8x128xf32>
    %c0_15 = arith.constant 0 : index
    %c0_16 = arith.constant 0 : index
    %20 = vector.load %arg6[%c0_15, %c0_16] : memref<8x384xf32, #tpu.memory_space<vmem>>, vector<8x128xf32>
    tpu.vector_store %arg6[%c0_15, %c0_16], %19 {strides = array<i32>} : memref<8x384xf32, #tpu.memory_space<vmem>>, vector<8x128xf32>,
    %c0_17 = arith.constant 0 : index
    %c128_18 = arith.constant 128 : index
    %21 = vector.load %arg6[%c0_17, %c128_18] : memref<8x384xf32, #tpu.memory_space<vmem>>, vector<8x256xf32>
    tpu.vector_store %arg6[%c0_17, %c128_18], %15 {strides = array<i32>} : memref<8x384xf32, #tpu.memory_space<vmem>>, vector<8x256xf32>,
    return
  }
  func.func @transform_0(%arg0: i32) -> (i32, i32) {
    %c0_i32 = arith.constant 0 : i32
    %c0_i32_0 = arith.constant 0 : i32
    return %arg0, %c0_i32 : i32, i32
  }
  func.func @transform_1(%arg0: i32) -> (i32, i32) {
    %c0_i32 = arith.constant 0 : i32
    %c0_i32_0 = arith.constant 0 : i32
    %c0_i32_1 = arith.constant 0 : i32
    return %c0_i32, %c0_i32_0 : i32, i32
  }
  func.func @transform_2(%arg0: i32) -> (i32, i32) {
    %c0_i32 = arith.constant 0 : i32
    %c0_i32_0 = arith.constant 0 : i32
    %c0_i32_1 = arith.constant 0 : i32
    return %c0_i32, %c0_i32_0 : i32, i32
  }
  func.func @transform_3(%arg0: i32) -> (i32, i32) {
    %c0_i32 = arith.constant 0 : i32
    %c0_i32_0 = arith.constant 0 : i32
    %c0_i32_1 = arith.constant 0 : i32
    return %c0_i32, %c0_i32_0 : i32, i32
  }
  func.func @transform_4(%arg0: i32) -> (i32, i32) {
    %c0_i32 = arith.constant 0 : i32
    %c0_i32_0 = arith.constant 0 : i32
    %c0_i32_1 = arith.constant 0 : i32
    return %c0_i32, %c0_i32_0 : i32, i32
  }
  func.func @transform_5(%arg0: i32) -> (i32, i32) {
    %c0_i32 = arith.constant 0 : i32
    %c0_i32_0 = arith.constant 0 : i32
    return %arg0, %c0_i32 : i32, i32
  }
}

</mosaic_0001>

<bundles_post_ra>
// kernel: tpu_custom_call.1
= control target key start
LH: loop header
LB: loop body
LE: loop exit
PB: predicated region body
PF: predicated region fallthrough
CT: control target
= control target key end

     0   :  { %10 = vsyncpa [#allocation3], 0  ;;  %s712_s0 = inlined_call_operand.hbm [shape: f32[8,128], index: 0, kind: input, shape index: {}]   ;;  %s713_s1 = inlined_call_operand.hbm [shape: f32[128,128], index: 1, kind: input, shape index: {}]   ;;  %s714_s2 = inlined_call_operand.hbm [shape: f32[128,256], index: 2, kind: input, shape index: {}]   ;;  %s715_s3 = inlined_call_operand.hbm [shape: f32[256,128], index: 3, kind: input, shape index: {}]   ;;  %s716_s4 = inlined_call_operand.vmem [shape: f32[1,512], index: 4, kind: input, shape index: {}]   ;;  %s717_s5 = inlined_call_operand.hbm [shape: f32[8,384], index: 5, kind: output, shape index: {}]  }
   0x1   :  { %11 = vsyncpa [#allocation6], 0 }
   0x2   :  { %12 = vsyncpa [#allocation9], 0 }
   0x3   :  { %13 = vsyncpa [#allocation4], 0  ;;  %s623_s18 = smov [#allocation5]  }
   0x4   :  { %s29_s19 = sshll.u32 %s623_s18, 4  ;;  %s30_s19 = int_to_ptr.vmem [resolvable:$true] %s29_s19 }
   0x5   :  { %s523_s20 = scalar_lea.vmem %s30_s19, 2048  ;;  %p528_p1 = scmp.lt.s32.totalorder %s30_s19, %s30_s19 }
   0x6   :  { %p524_p0 = scmp.ne.s32.totalorder %s30_s19, %s523_s20  ;;  %p529_p2 = scmp.lt.s32.totalorder %s523_s20, %s523_s20 }
   0x8   :  { %p530_p3 = por %p529_p2, %p528_p1 }
   0xa   :  { %p531_p4 = pnand %p530_p3, %p524_p0 }
   0xc   :  { %534 = shalt.err (!%p531_p4)
}
   0xd   :  { %s624_s21 = smov 128   ;;  %s625_s22 = smov 8  }
   0xe   :  { %35 = dma.hbm_to_vmem [thread:$0]  %s713_s1, 2048, %s30_s19, [#allocation6], %s624_s21, %s624_s21, %s625_s22  }
   0xf   :  { %s626_s25 = smov [#allocation2]   ;;  %s627_s27 = smov [#allocation7]  }
  0x10   :  { %s20_s26 = sshll.u32 %s626_s25, 4  ;;  %s41_s28 = sshll.u32 %s627_s27, 4  ;;  %s21_s26 = int_to_ptr.vmem [resolvable:$true] %s20_s26  ;;  %s42_s28 = int_to_ptr.vmem [resolvable:$true] %s41_s28 }
  0x11   :  { %s543_s29 = scalar_lea.vmem %s21_s26, 128  ;;  %p548_p6 = scmp.lt.s32.totalorder %s21_s26, %s21_s26 }
  0x12   :  { %p544_p5 = scmp.ne.s32.totalorder %s21_s26, %s543_s29  ;;  %p549_p7 = scmp.lt.s32.totalorder %s543_s29, %s543_s29 }
  0x14   :  { %p550_p8 = por %p549_p7, %p548_p6 }
  0x16   :  { %p551_p9 = pnand %p550_p8, %p544_p5 }
  0x18   :  { %554 = shalt.err (!%p551_p9)
}
  0x19   :  { %23 = dma.hbm_to_vmem [thread:$0]  %s712_s0, 128, %s21_s26, [#allocation3]  }
  0x1a   :  { %s563_s7 = scalar_lea.vmem %s42_s28, 4096  ;;  %p568_p11 = scmp.lt.s32.totalorder %s42_s28, %s42_s28 }
  0x1b   :  { %p564_p10 = scmp.ne.s32.totalorder %s42_s28, %s563_s7  ;;  %p569_p12 = scmp.lt.s32.totalorder %s563_s7, %s563_s7 }
  0x1d   :  { %p570_p13 = por %p569_p12, %p568_p11 }
  0x1f   :  { %p571_p0 = pnand %p570_p13, %p564_p10 }
  0x21   :  { %574 = shalt.err (!%p571_p0)
}
  0x22   :  { %s628_s1 = smov 256   ;;  %s629_s8 = smov 16  }
  0x23   :  { %47 = dma.hbm_to_vmem [thread:$0]  %s714_s2, 4096, %s42_s28, [#allocation6], %s628_s1, %s628_s1, %s629_s8  }
  0x24   :  { %s630_s11 = smov [#allocation8]  }
  0x25   :  { %s53_s12 = sshll.u32 %s630_s11, 4  ;;  %s54_s12 = int_to_ptr.vmem [resolvable:$true] %s53_s12 }
  0x26   :  { %s583_s13 = scalar_lea.vmem %s54_s12, 4096  ;;  %p588_p2 = scmp.lt.s32.totalorder %s54_s12, %s54_s12 }
  0x27   :  { %p584_p1 = scmp.ne.s32.totalorder %s54_s12, %s583_s13  ;;  %p589_p3 = scmp.lt.s32.totalorder %s583_s13, %s583_s13 }
  0x29   :  { %p590_p4 = por %p589_p3, %p588_p2 }
  0x2b   :  { %p591_p5 = pnand %p590_p4, %p584_p1 }
  0x2d   :  { %594 = shalt.err (!%p591_p5)
}
  0x2e   :  { %59 = dma.hbm_to_vmem [thread:$0]  %s715_s3, 4096, %s54_s12, [#allocation9], %s624_s21, %s624_s21, %s625_s22  }
  0x2f   :  { %615 = dma.done.wait [#allocation3], 128  }
  0x30   :  { %616 = vsyncadd [#allocation3], 4294967168 }
  0x31   :  { %617 = dma.done.wait [#allocation6], 6144  }
  0x32   :  { %618 = vsyncadd [#allocation6], 4294961152 }
  0x33   :  { %619 = dma.done.wait [#allocation9], 4096  }
  0x34   :  { %620 = vsyncadd [#allocation9], 4294963200  ;;  %v631_v0 = vmov 0.0   ;;  %vm632_vm0 = vmmov 0   ;;  %v93_v1 = vld [vmem:[#allocation5 + $0x78] sm:$0xff]  ;;  %v92_v2 = vld [vmem:[#allocation5 + $0x70] sm:$0xff] }
  0x35   :  { %469 = vmatprep.subr.mxu0 %v631_v0  ;;  %501 = vmatprep.mubr.msk.f32.mxu0 %vm632_vm0, %v631_v0  ;;  %v91_v3 = vld [vmem:[#allocation5 + $0x68] sm:$0xff]  ;;  %v90_v4 = vld [vmem:[#allocation5 + $0x60] sm:$0xff]  ;;  %v89_v5 = vld [vmem:[#allocation5 + $0x58] sm:$0xff]  ;;  %s633_s19 = smov [#allocation10]  }
  0x36   :  { %278 = vmatprep.mubr.f32.mxu1 %v631_v0  ;;  %470 = vmatpush3.msra.mxu0 %v93_v1  ;;  %v202_v6 = vld [vmem:[#allocation7 + $0xf8] sm:$0xff]  ;;  %v201_v7 = vld [vmem:[#allocation7 + $0xf0] sm:$0xff]  ;;  %v200_v8 = vld [vmem:[#allocation7 + $0xe8] sm:$0xff]  ;;  %s404_s20 = sshll.u32 %s633_s19, 4  ;;  %s405_s20 = int_to_ptr.vmem [resolvable:$true] %s404_s20 }
  0x37   :  { %471 = vmatprep.subr.mxu0 %v631_v0  ;;  %214 = vmatprep.subr.mxu1 %v202_v6  ;;  %v199_v9 = vld [vmem:[#allocation7 + $0xe0] sm:$0xff]  ;;  %v198_v10 = vld [vmem:[#allocation7 + $0xd8] sm:$0xff]  ;;  %v88_v11 = vld [vmem:[#allocation5 + $0x50] sm:$0xff]  ;;  %s595_s21 = scalar_lea.vmem %s405_s20, 384  ;;  %p600_p7 = scmp.lt.s32.totalorder %s405_s20, %s405_s20 }
  0x38   :  { %472 = vmatpush3.msra.mxu0 %v92_v2  ;;  %215 = vmatpush1.msra.mxu1 %v201_v7  ;;  %v197_v12 = vld [vmem:[#allocation7 + $0xd0] sm:$0xff]  ;;  %v196_v13 = vld [vmem:[#allocation7 + $0xc8] sm:$0xff]  ;;  %v195_v15 = vld [vmem:[#allocation7 + $0xc0] sm:$0xff]  ;;  %p596_p6 = scmp.ne.s32.totalorder %s405_s20, %s595_s21  ;;  %p601_p8 = scmp.lt.s32.totalorder %s595_s21, %s595_s21 }
  0x39   :  { %473 = vmatprep.subr.mxu0 %v631_v0  ;;  %216 = vmatprep.subr.mxu1 %v200_v8  ;;  %v87_v14 = vld [vmem:[#allocation5 + $0x48] sm:$0xff]  ;;  %v194_v16 = vld [vmem:[#allocation7 + $0xb8] sm:$0xff]  ;;  %v86_v17 = vld [vmem:[#allocation5 + $0x40] sm:$0xff] }
  0x3a   :  { %474 = vmatpush3.msra.mxu0 %v91_v3  ;;  %217 = vmatpush1.msra.mxu1 %v199_v9  ;;  %v193_v18 = vld [vmem:[#allocation7 + $0xb0] sm:$0xff]  ;;  %v192_v19 = vld [vmem:[#allocation7 + $0xa8] sm:$0xff]  ;;  %v85_v20 = vld [vmem:[#allocation5 + $0x38] sm:$0xff]  ;;  %p602_p9 = por %p601_p8, %p600_p7 }
  0x3b   :  { %475 = vmatprep.subr.mxu0 %v631_v0  ;;  %218 = vmatprep.subr.mxu1 %v198_v10  ;;  %v191_v21 = vld [vmem:[#allocation7 + $0xa0] sm:$0xff]  ;;  %v190_v22 = vld [vmem:[#allocation7 + $0x98] sm:$0xff]  ;;  %v84_v23 = vld [vmem:[#allocation5 + $0x30] sm:$0xff] }
  0x3c   :  { %476 = vmatpush3.msra.mxu0 %v90_v4  ;;  %219 = vmatpush1.msra.mxu1 %v197_v12  ;;  %v189_v24 = vld [vmem:[#allocation7 + $0x90] sm:$0xff]  ;;  %v188_v25 = vld [vmem:[#allocation7 + $0x88] sm:$0xff]  ;;  %v187_v27 = vld [vmem:[#allocation7 + $0x80] sm:$0xff]  ;;  %p603_p10 = pnand %p602_p9, %p596_p6 }
  0x3d   :  { %477 = vmatprep.subr.mxu0 %v631_v0  ;;  %220 = vmatprep.subr.mxu1 %v196_v13  ;;  %v83_v26 = vld [vmem:[#allocation5 + $0x28] sm:$0xff]  ;;  %v186_v28 = vld [vmem:[#allocation7 + $0x78] sm:$0xff]  ;;  %v82_v29 = vld [vmem:[#allocation5 + $0x20] sm:$0xff] }
  0x3e   :  { %478 = vmatpush3.msra.mxu0 %v89_v5  ;;  %221 = vmatpush1.msra.mxu1 %v195_v15  ;;  %v185_v30 = vld [vmem:[#allocation7 + $0x70] sm:$0xff]  ;;  %v184_v31 = vld [vmem:[#allocation7 + $0x68] sm:$0xff]  ;;  %v81_v32 = vld [vmem:[#allocation5 + $0x18] sm:$0xff] }
  0x3f   :  { %479 = vmatprep.subr.mxu0 %v631_v0  ;;  %222 = vmatprep.subr.mxu1 %v194_v16  ;;  %v183_v33 = vld [vmem:[#allocation7 + $0x60] sm:$0xff]  ;;  %v182_v34 = vld [vmem:[#allocation7 + $0x58] sm:$0xff]  ;;  %v80_v35 = vld [vmem:[#allocation5 + $0x10] sm:$0xff] }
  0x40   :  { %480 = vmatpush3.msra.mxu0 %v88_v11  ;;  %223 = vmatpush1.msra.mxu1 %v193_v18  ;;  %v181_v36 = vld [vmem:[#allocation7 + $0x50] sm:$0xff]  ;;  %v180_v37 = vld [vmem:[#allocation7 + $0x48] sm:$0xff]  ;;  %v179_v39 = vld [vmem:[#allocation7 + $0x40] sm:$0xff] }
  0x41   :  { %481 = vmatprep.subr.mxu0 %v631_v0  ;;  %224 = vmatprep.subr.mxu1 %v192_v19  ;;  %v79_v38 = vld [vmem:[#allocation5 + $0x8] sm:$0xff]  ;;  %v178_v40 = vld [vmem:[#allocation7 + $0x38] sm:$0xff]  ;;  %v78_v41 = vld [vmem:[#allocation5] sm:$0xff] }
  0x42   :  { %482 = vmatpush3.msra.mxu0 %v87_v14  ;;  %225 = vmatpush1.msra.mxu1 %v191_v21  ;;  %v177_v42 = vld [vmem:[#allocation7 + $0x30] sm:$0xff]  ;;  %v74_v43 = vld [vmem:[#allocation2] sm:$0xff]  ;;  %v176_v44 = vld [vmem:[#allocation7 + $0x28] sm:$0xff] }
  0x43   :  { %483 = vmatprep.subr.mxu0 %v631_v0  ;;  %226 = vmatprep.subr.mxu1 %v190_v22  ;;  %v175_v45 = vld [vmem:[#allocation7 + $0x20] sm:$0xff]  ;;  %v174_v46 = vld [vmem:[#allocation7 + $0x18] sm:$0xff]  ;;  %v173_v47 = vld [vmem:[#allocation7 + $0x10] sm:$0xff] }
  0x44   :  { %484 = vmatpush3.msra.mxu0 %v86_v17  ;;  %227 = vmatpush1.msra.mxu1 %v189_v24  ;;  %v172_v48 = vld [vmem:[#allocation7 + $0x8] sm:$0xff]  ;;  %v171_v49 = vld [vmem:[#allocation7] sm:$0xff]  ;;  %v318_v50 = vld [vmem:[#allocation8 + $0xf8] sm:$0xff] }
  0x45   :  { %485 = vmatprep.subr.mxu0 %v631_v0  ;;  %228 = vmatprep.subr.mxu1 %v188_v25  ;;  %v302_v51 = vld [vmem:[#allocation8 + $0x78] sm:$0xff]  ;;  %v317_v52 = vld [vmem:[#allocation8 + $0xf0] sm:$0xff]  ;;  %v316_v54 = vld [vmem:[#allocation8 + $0xe8] sm:$0xff] }
  0x46   :  { %486 = vmatpush3.msra.mxu0 %v85_v20  ;;  %229 = vmatpush1.msra.mxu1 %v187_v27  ;;  %v301_v53 = vld [vmem:[#allocation8 + $0x70] sm:$0xff]  ;;  %v300_v55 = vld [vmem:[#allocation8 + $0x68] sm:$0xff]  ;;  %v315_v56 = vld [vmem:[#allocation8 + $0xe0] sm:$0xff] }
  0x47   :  { %487 = vmatprep.subr.mxu0 %v631_v0  ;;  %230 = vmatprep.subr.mxu1 %v186_v28  ;;  %v299_v57 = vld [vmem:[#allocation8 + $0x60] sm:$0xff]  ;;  %v314_v58 = vld [vmem:[#allocation8 + $0xd8] sm:$0xff]  ;;  %v313_v60 = vld [vmem:[#allocation8 + $0xd0] sm:$0xff] }
  0x48   :  { %488 = vmatpush3.msra.mxu0 %v84_v23  ;;  %231 = vmatpush1.msra.mxu1 %v185_v30  ;;  %v298_v59 = vld [vmem:[#allocation8 + $0x58] sm:$0xff]  ;;  %v297_v61 = vld [vmem:[#allocation8 + $0x50] sm:$0xff]  ;;  %v312_v62 = vld [vmem:[#allocation8 + $0xc8] sm:$0xff]  ;;  %v204_v23 = vlaneseq }
  0x49   :  { %489 = vmatprep.subr.mxu0 %v631_v0  ;;  %232 = vmatprep.subr.mxu1 %v184_v31  ;;  %v296_v63 = vld [vmem:[#allocation8 + $0x48] sm:$0xff]  ;;  %v295_v1 = vld [vmem:[#allocation8 + $0x40] sm:$0xff]  ;;  %v310_v2 = vld [vmem:[#allocation8 + $0xb8] sm:$0xff] }
  0x4a   :  { %490 = vmatpush3.msra.mxu0 %v83_v26  ;;  %233 = vmatpush1.msra.mxu1 %v183_v33  ;;  %v294_v3 = vld [vmem:[#allocation8 + $0x38] sm:$0xff]  ;;  %v309_v4 = vld [vmem:[#allocation8 + $0xb0] sm:$0xff]  ;;  %v308_v6 = vld [vmem:[#allocation8 + $0xa8] sm:$0xff]  ;;  %v205_v24 = vshrl.u32 %v204_v23, 7 }
  0x4b   :  { %491 = vmatprep.subr.mxu0 %v631_v0  ;;  %234 = vmatprep.subr.mxu1 %v182_v34  ;;  %v293_v5 = vld [vmem:[#allocation8 + $0x30] sm:$0xff]  ;;  %v292_v7 = vld [vmem:[#allocation8 + $0x28] sm:$0xff]  ;;  %v307_v8 = vld [vmem:[#allocation8 + $0xa0] sm:$0xff] }
  0x4c   :  { %492 = vmatpush3.msra.mxu0 %v82_v29  ;;  %235 = vmatpush1.msra.mxu1 %v181_v36  ;;  %v291_v9 = vld [vmem:[#allocation8 + $0x20] sm:$0xff]  ;;  %v415_v10 = vld [vmem:[%s716_s4] ss:$0 sm:$0xff]  ;;  %v305_v17 = vld [vmem:[#allocation8 + $0x90] sm:$0xff]  ;;  %v206_v25 = vsub.s32 0, %v205_v24  ;;  %v210_v27 = vsub.s32 1, %v205_v24 }
  0x4d   :  { %493 = vmatprep.subr.mxu0 %v631_v0  ;;  %236 = vmatprep.subr.mxu1 %v180_v37  ;;  %v306_v15 = vld [vmem:[#allocation8 + $0x98] sm:$0xff]  ;;  %v289_v18 = vld [vmem:[#allocation8 + $0x10] sm:$0xff]  ;;  %v304_v19 = vld [vmem:[#allocation8 + $0x88] sm:$0xff] }
  0x4e   :  { %494 = vmatpush3.msra.mxu0 %v81_v32  ;;  %237 = vmatpush1.msra.mxu1 %v179_v39  ;;  %v290_v16 = vld [vmem:[#allocation8 + $0x18] sm:$0xff]  ;;  %v288_v20 = vld [vmem:[#allocation8 + $0x8] sm:$0xff]  ;;  %v303_v21 = vld [vmem:[#allocation8 + $0x80] sm:$0xff] }
  0x4f   :  { %495 = vmatprep.subr.mxu0 %v631_v0  ;;  %238 = vmatprep.subr.mxu1 %v178_v40  ;;  %v287_v22 = vld [vmem:[#allocation8] sm:$0xff]  ;;  %v76_v26 = vld [vmem:[%s716_s4 + $0x1] sm:$0x3]  ;;  %v416_v37 = vld [vmem:[%s716_s4 + $0x3] ss:$0 sm:$0xff] }
  0x50   :  { %496 = vmatpush3.msra.mxu0 %v80_v35  ;;  %239 = vmatpush1.msra.mxu1 %v177_v42  ;;  %v207_v28 = vrot.slane %v76_v26, %v206_v25  ;;  %v211_v29 = vrot.slane %v76_v26, %v210_v27 }
  0x51   :  { %497 = vmatprep.subr.mxu0 %v631_v0  ;;  %240 = vmatprep.subr.mxu1 %v176_v44 }
  0x52   :  { %498 = vmatpush3.msra.mxu0 %v79_v38  ;;  %241 = vmatpush1.msra.mxu1 %v175_v45 }
  0x53   :  { %499 = vmatprep.subr.mxu0 %v631_v0  ;;  %242 = vmatprep.subr.mxu1 %v174_v46  ;;  %v311_v0 = vld [vmem:[#allocation8 + $0xc0] sm:$0xff] }
  0x54   :  { %500 = vmatpush3.msra.mxu0 %v78_v41  ;;  %243 = vmatpush1.msra.mxu1 %v173_v47 }
  0x55   :  { %502 = vmatmul.mubr.f32.vlgmr.msra.gmra.mxu0 %v74_v43  ;;  %244 = vmatprep.subr.mxu1 %v172_v48 }
  0x56   :  { %245 = vmatpush1.msra.mxu1 %v171_v49  ;;  %434 = vmatprep.subr.mxu0 %v318_v50 }
  0x57   :  { %435 = vmatpush3.msra.mxu0 %v302_v51 }
  0x58   :  { %436 = vmatprep.subr.mxu0 %v317_v52 }
  0x59   :  { %437 = vmatpush3.msra.mxu0 %v301_v53 }
  0x5a   :  { %438 = vmatprep.subr.mxu0 %v316_v54 }
  0x5b   :  { %439 = vmatpush3.msra.mxu0 %v300_v55 }
  0x5c   :  { %440 = vmatprep.subr.mxu0 %v315_v56 }
  0x5d   :  { %441 = vmatpush3.msra.mxu0 %v299_v57 }
  0x5e   :  { %442 = vmatprep.subr.mxu0 %v314_v58 }
  0x5f   :  { %443 = vmatpush3.msra.mxu0 %v298_v59 }
  0x60   :  { %444 = vmatprep.subr.mxu0 %v313_v60 }
  0x61   :  { %445 = vmatpush3.msra.mxu0 %v297_v61 }
  0x62   :  { %446 = vmatprep.subr.mxu0 %v312_v62 }
  0x63   :  { %447 = vmatpush3.msra.mxu0 %v296_v63 }
  0x64   :  { %448 = vmatprep.subr.mxu0 %v311_v0 }
  0x65   :  { %449 = vmatpush3.msra.mxu0 %v295_v1 }
  0x66   :  { %450 = vmatprep.subr.mxu0 %v310_v2 }
  0x67   :  { %451 = vmatpush3.msra.mxu0 %v294_v3 }
  0x68   :  { %452 = vmatprep.subr.mxu0 %v309_v4 }
  0x69   :  { %453 = vmatpush3.msra.mxu0 %v293_v5 }
  0x6a   :  { %454 = vmatprep.subr.mxu0 %v308_v6 }
  0x6b   :  { %455 = vmatpush3.msra.mxu0 %v292_v7 }
  0x6c   :  { %456 = vmatprep.subr.mxu0 %v307_v8 }
  0x6d   :  { %457 = vmatpush3.msra.mxu0 %v291_v9 }
  0x6e   :  { %458 = vmatprep.subr.mxu0 %v306_v15 }
  0x6f   :  { %459 = vmatpush3.msra.mxu0 %v290_v16 }
  0x70   :  { %460 = vmatprep.subr.mxu0 %v305_v17 }
  0x71   :  { %461 = vmatpush3.msra.mxu0 %v289_v18 }
  0x72   :  { %462 = vmatprep.subr.mxu0 %v304_v19 }
  0x73   :  { %463 = vmatpush3.msra.mxu0 %v288_v20 }
  0x74   :  { %464 = vmatprep.subr.mxu0 %v303_v21 }
  0x75   :  { %465 = vmatpush3.msra.mxu0 %v287_v22 }
 0x115   :  { %v166_v11 = vpop.f32.mrf.mxu0 }
 0x116   :  { %v167_v12 = vadd.f32 %v415_v10, %v166_v11 }
 0x117   :  { %v503_v13 = vpop.f32.mrf.mxu0 }
 0x118   :  { %v170_v14 = vmax.f32 %v167_v12, 0.0 }
 0x11a   :  { %279 = vmatmul.mubr.f32.vlgmr.msra.gmra.mxu1 %v170_v14 }
 0x1da   :  { %v280_v30 = vpop.f32.mrf.mxu1 }
 0x1db   :  { %v281_v31 = vadd.f32 %v280_v30, %v207_v28 }
 0x1dc   :  { %v282_v32 = vpop.f32.mrf.mxu1 }
 0x1dd   :  { %v285_v33 = vmax.f32 %v281_v31, 0.0  ;;  %v283_v34 = vadd.f32 %v282_v32, %v211_v29 }
 0x1df   :  { %396 = vst [vmem:[#allocation10 + $0x8] sm:$0xff] %v285_v33  ;;  %v286_v35 = vmax.f32 %v283_v34, 0.0 }
 0x1e1   :  { %397 = vst [vmem:[#allocation10 + $0x10] sm:$0xff] %v286_v35  ;;  %389 = vmatprep.mubr.f32.mxu0 %v286_v35 }
 0x1e2   :  { %390 = vmatmul.mubr.f32.vlgmr.msra.gmra.mxu0 %v285_v33 }
 0x2a2   :  { %v466_v36 = vpop.f32.mrf.mxu0 }
 0x2a4   :  { %v467_v38 = vpop.f32.mrf.mxu0 }
 0x2a5   :  { %v468_v39 = vadd.f32 %v467_v38, %v466_v36 }
 0x2a7   :  { %v392_v40 = vadd.f32 %v468_v39, %v416_v37 }
 0x2a9   :  { %395 = vst [vmem:[#allocation10] sm:$0xff] %v392_v40 }
 0x2aa   :  { %606 = shalt.err (!%p603_p10)
}
 0x2ab   :  { %407 = dma.vmem_to_hbm [thread:$0]  %s405_s20, 384, %s717_s5, [#allocation4]  }
 0x2ac   :  { %621 = dma.done.wait [#allocation4], 384  }
 0x2ad   :  { %622 = vsyncadd [#allocation4], 4294966912 }
 0x2ae   :  { %411 = vsyncpa [#allocation3], 1 }
 0x2af   :  { %412 = vsyncpa [#allocation6], 1 }
 0x2b0   :  { %413 = vsyncpa [#allocation9], 1 }
 0x2b1   :  { %414 = vsyncpa [#allocation4], 1 }

</bundles_post_ra>
